<compile_context>
chip_gen: v7x
topology: tpu7x:2x2x1
jax: 0.10.0
libtpu: 0.0.40
codegen_flags: <defaults>
</compile_context>

<pallas_src>
import math

import jax
import jax.numpy as jnp
from jax.experimental import pallas as pl
from jax.experimental.pallas import tpu as pltpu


_LANE = 128
_ONEHOT_VMEM_BUDGET = 24 << 20      # conservative across v5e/v6e/v7x scoped VMEM
_VMEM_LIMIT_CAP = 48 << 20          # stay well under v7x's 64 MiB physical VMEM
_DMA_MAX_TOKENS_PER_CALL = 1 << 15  # caps the SMEM footprint of prefetched ids


def _round_up(x, m):
    return (x + m - 1) // m * m


# ---------------------------------------------------------------------------
# Path 1: VMEM-resident table — exact one-hot matmul gather on the MXU.
# ---------------------------------------------------------------------------
def _onehot_gather_kernel(ids_ref, table_ref, out_ref):
    # ids_ref:   (tile, 1)  int32
    # table_ref: (V, Dp)    folded table (data @ W + b), lane-padded, MXU dtype
    # out_ref:   (tile, Dp) out dtype
    ids = ids_ref[...]
    tile = ids.shape[0]
    V = table_ref.shape[0]
    vocab_iota = jax.lax.broadcasted_iota(jnp.int32, (tile, V), 1)
    # One-hot built directly in the MXU dtype (0/1 are exact in bf16).  Ids
    # outside [0, V) yield an all-zero row where PyTorch index_select raises.
    onehot = (ids == vocab_iota).astype(table_ref.dtype)
    out_ref[...] = jnp.dot(
        onehot, table_ref[...], preferred_element_type=jnp.float32
    ).astype(out_ref.dtype)


def _onehot_gather(ids_flat, table, tile, out_dtype, vmem_limit):
    n_pad = ids_flat.shape[0]
    V, Dp = table.shape
    # TODO(synk): a single-buffered table BlockSpec (pipeline_mode=pl.Buffered(1))
    # would halve the resident-table footprint on v7x; skipped here because the
    # constant index_map already suppresses re-fetches and Buffered(1) support
    # in the main pallas_call pipeline is version-dependent.
    return pl.pallas_call(
        _onehot_gather_kernel,
        out_shape=jax.ShapeDtypeStruct((n_pad, Dp), out_dtype),
        grid_spec=pltpu.PrefetchScalarGridSpec(
            num_scalar_prefetch=0,
            grid=(n_pad // tile,),
            in_specs=[
                pl.BlockSpec((tile, 1), lambda i: (i, 0)),   # token-id tile
                pl.BlockSpec((V, Dp), lambda i: (0, 0)),     # resident folded table
            ],
            out_specs=pl.BlockSpec((tile, Dp), lambda i: (i, 0)),
        ),
        compiler_params=pltpu.CompilerParams(
            dimension_semantics=("parallel",),
            vmem_limit_bytes=vmem_limit),
    )(ids_flat.reshape(n_pad, 1), table)


# ---------------------------------------------------------------------------
# Path 2: general vocab — SMEM ids + per-row HBM->out_ref DMA gather.
# ---------------------------------------------------------------------------
def _dma_gather_kernel(ids_smem, table_hbm, out_ref, copy_sem):
    # ids_smem:  (n_chunk,) int32, scalar-prefetched into SMEM
    # table_hbm: (V, Dp)    folded table left in HBM (memory_space=pl.ANY)
    # out_ref:   (tile, Dp) VMEM output block; rows are DMA'd straight into it
    # copy_sem:  (1,)       DMA semaphore shared by all row copies of the tile
    tile = out_ref.shape[0]
    V = table_hbm.shape[0]
    base = pl.program_id(0) * tile

    def issue(r, carry):
        tok = ids_smem[base + r]
        # Clamp out-of-range ids instead of issuing an OOB HBM read (PyTorch's
        # index_select would raise on such inputs).
        tok = jnp.minimum(jnp.maximum(tok, 0), V - 1)
        pltpu.make_async_copy(
            table_hbm.at[pl.ds(tok, 1), :],
            out_ref.at[pl.ds(r, 1), :],
            copy_sem.at[0],
        ).start()
        return carry

    # Unrolled so the LLO scheduler can co-issue descriptor pushes with the
    # scalar address math (the gather is descriptor-issue bound).
    jax.lax.fori_loop(0, tile, issue, 0, unroll=8)

    # DMA semaphores account in bytes: every row copy signals copy_sem with one
    # row's bytes, so a single wait sized to the whole (tile, Dp) output block
    # consumes exactly this tile's completions — no per-row drain loop.
    pltpu.make_async_copy(out_ref, out_ref, copy_sem.at[0]).wait()


def _dma_gather_chunk(ids_chunk, table, tile, vmem_limit):
    n = ids_chunk.shape[0]
    _, Dp = table.shape
    return pl.pallas_call(
        _dma_gather_kernel,
        out_shape=jax.ShapeDtypeStruct((n, Dp), table.dtype),
        grid_spec=pltpu.PrefetchScalarGridSpec(
            num_scalar_prefetch=1,                          # ids -> SMEM
            grid=(n // tile,),
            in_specs=[pl.BlockSpec(memory_space=pl.ANY)],   # table stays in HBM
            out_specs=pl.BlockSpec((tile, Dp), lambda i, ids: (i, 0)),
            scratch_shapes=[pltpu.SemaphoreType.DMA((1,))],
        ),
        compiler_params=pltpu.CompilerParams(
            dimension_semantics=("parallel",),
            vmem_limit_bytes=vmem_limit),
    )(ids_chunk, table)


def _dma_gather(ids_flat, table, tile, vmem_limit):
    # Chunk the token axis so the scalar-prefetched ids never exhaust SMEM
    # (1-D SMEM arrays pad to next_pow2(4*N)).
    n_pad = ids_flat.shape[0]
    chunk = min(n_pad, _round_up(_DMA_MAX_TOKENS_PER_CALL, tile))
    outs = [
        _dma_gather_chunk(ids_flat[s:s + chunk], table, tile, vmem_limit)
        for s in range(0, n_pad, chunk)
    ]
    return outs[0] if len(outs) == 1 else jnp.concatenate(outs, axis=0)


# ---------------------------------------------------------------------------
# Wrapper: ComputedWordEmb.forward
# ---------------------------------------------------------------------------
def computed_word_emb(x, data, w, b, maskid, *, token_tile=512, gather_mode=None,
                      onehot_mxu_dtype=jnp.bfloat16, out_dtype=jnp.float32):
    """ComputedWordEmb.forward with a Linear `computer` folded into the gather.

    x: int ids of any shape.  data: (V, Din), w: (Din, Dout), b: (1, Dout).
    Returns (emb: x.shape + (Dout,) in out_dtype, mask: x.shape bool or None).
    Pass onehot_mxu_dtype=jnp.float32 for bit-accurate one-hot gathers.
    """
    # TODO(synk): `computer` can be an arbitrary nn.Module in the original; only
    # a linear computer folds into the table — a non-linear computer would need
    # its own fused compute stage after the gather.
    xshape = x.shape
    N = math.prod(xshape)
    V, Din = data.shape
    Dout = w.shape[-1]

    # Fold the linear "computer" into a (V, Dout) table once (exact for Linear).
    table = (data.astype(jnp.float32) @ w.astype(jnp.float32)
             + b.reshape(1, Dout).astype(jnp.float32))
    Dp = _round_up(Dout, _LANE)                     # lane-dense output stores
    if Dp != Dout:
        table = jnp.pad(table, ((0, 0), (0, Dp - Dout)))

    out_isz = jnp.dtype(out_dtype).itemsize
    mxu_isz = jnp.dtype(onehot_mxu_dtype).itemsize

    # Token tile: multiples of 16 keep both f32 and bf16 output blocks legal.
    tile = max(16, _round_up(min(int(token_tile), _round_up(N, 16)), 16))

    def onehot_need(t):
        return (2 * V * Dp * mxu_isz                      # table, double-buffered
                + 2 * t * Dp * out_isz                    # out tile, double-buffered
                + t * _round_up(V, _LANE) * mxu_isz       # one-hot intermediate
                + 2 * t * 4)                              # ids tile

    if gather_mode is None:
        # VMEM-budget crossover instead of a hard vocab cutoff.
        gather_mode = "onehot" if onehot_need(tile) <= _ONEHOT_VMEM_BUDGET else "dma"

    if gather_mode == "onehot":
        while tile > 16 and onehot_need(tile) > _ONEHOT_VMEM_BUDGET:
            tile = max(16, _round_up(tile // 2, 16))
        need = onehot_need(tile)
    elif gather_mode == "dma":
        need = 2 * tile * Dp * out_isz
    else:
        raise ValueError(f"unknown gather_mode: {gather_mode!r}")
    vmem_limit = int(min(_VMEM_LIMIT_CAP, max(need + (4 << 20), 16 << 20)))

    # Pad the flattened token axis with valid id 0 (padded rows sliced off).
    n_pad = _round_up(N, tile)
    ids = x.reshape(-1).astype(jnp.int32)
    if n_pad != N:
        ids = jnp.pad(ids, (0, n_pad - N))

    if gather_mode == "onehot":
        emb_flat = _onehot_gather(ids, table.astype(onehot_mxu_dtype), tile,
                                  out_dtype, vmem_limit)
    else:
        emb_flat = _dma_gather(ids, table.astype(out_dtype), tile, vmem_limit)

    emb = emb_flat[:N, :Dout].reshape(*xshape, Dout)
    # Cheap elementwise glue, matches `x != self.maskid` in PyTorch.
    mask = (x != maskid) if maskid is not None else None
    return emb, mask


if __name__ == "__main__":
    root = jax.random.PRNGKey(0)

    def reference(x, data, w, b, maskid):
        rows = jnp.take(data, x.reshape(-1), axis=0)
        emb = (rows @ w + b.reshape(1, -1)).reshape(*x.shape, -1)
        return emb, (x != maskid)

    def make_case(seed, B, S, V, Din, Dout):
        kd, kw, kb, kx = jax.random.split(jax.random.fold_in(root, seed), 4)
        data = jax.random.normal(kd, (V, Din), dtype=jnp.float32)
        w = jax.random.normal(kw, (Din, Dout), dtype=jnp.float32) * (1.0 / math.sqrt(Din))
        b = jax.random.normal(kb, (1, Dout), dtype=jnp.float32) * 0.01
        x = jax.random.randint(kx, (B, S), minval=0, maxval=V, dtype=jnp.int32)
        return x, data, w, b

    maskid = 0
    cases = [
        # (seed, B, S,  V,   Din, Dout, token_tile)
        (1,      2, 8,  12,  32,  24,   512),   # single-tile toy shapes
        (2,      4, 96, 300, 48,  160,  128),   # multi-tile grid, padded Dout
    ]

    for seed, B, S, V, Din, Dout, tt in cases:
        x, data, w, b = make_case(seed, B, S, V, Din, Dout)
        emb_ref, mask_ref = reference(x, data, w, b, maskid)
        runs = [
            ("onehot", dict(gather_mode="onehot"), 5e-2),              # bf16 MXU (default)
            ("onehot_f32", dict(gather_mode="onehot",
                                onehot_mxu_dtype=jnp.float32), 2e-3),  # bit-accurate option
            ("dma", dict(gather_mode="dma"), 2e-3),                    # HBM row-gather path
        ]
        for name, kw, tol in runs:
            emb, mask = computed_word_emb(x, data, w, b, maskid, token_tile=tt, **kw)
            emb = jax.block_until_ready(emb)
            mask = jax.block_until_ready(mask)
            assert emb.shape == (B, S, Dout) and emb.dtype == jnp.float32, (seed, name)
            assert mask.shape == (B, S) and mask.dtype == jnp.bool_, (seed, name)
            assert jnp.allclose(emb, emb_ref, atol=tol, rtol=tol), (seed, name)
            assert jnp.array_equal(mask, mask_ref), (seed, name)

    # Auto heuristic (VMEM-budget rule) + optional bf16 output (halves the
    # dominant output HBM write traffic).
    x, data, w, b = make_case(3, 2, 8, 64, 32, 48)
    emb_ref, _ = reference(x, data, w, b, maskid)
    emb_bf16, _ = computed_word_emb(x, data, w, b, maskid, out_dtype=jnp.bfloat16)
    emb_bf16 = jax.block_until_ready(emb_bf16)
    assert emb_bf16.dtype == jnp.bfloat16
    assert jnp.allclose(emb_bf16.astype(jnp.float32), emb_ref, atol=5e-2, rtol=5e-2)

    print("KERNEL_OK")
</pallas_src>

<mosaic_0001>
module attributes {stable_mosaic.version = 11 : i64} {
  func.func @_onehot_gather_kernel(%arg0: i32, %arg1: memref<16x1xi32, #tpu.memory_space<vmem>>, %arg2: memref<12x128xbf16, #tpu.memory_space<vmem>>, %arg3: memref<16x128xf32, #tpu.memory_space<vmem>>) attributes {dimension_semantics = [#tpu.dimension_semantics<parallel>], iteration_bounds = array<i64: 1>, scalar_prefetch = 0 : i64, scratch_operands = 0 : i64, tpu.core_type = #tpu.core_type<tc>, window_params = [{transform_indices = @transform_0, window_bounds = array<i64: 16, 1>}, {pipeline_mode = #tpu.pipeline_mode<synchronous>, transform_indices = @transform_1, window_bounds = array<i64: 12, 128>}, {transform_indices = @transform_2, window_bounds = array<i64: 16, 128>}]} {
    %c0 = arith.constant 0 : index
    %c0_0 = arith.constant 0 : index
    %0 = vector.load %arg1[%c0, %c0_0] : memref<16x1xi32, #tpu.memory_space<vmem>>, vector<16x1xi32>
    %1 = tpu.iota {dimensions = array<i32: 1>} : vector<16x12xi32>
    %2 = vector.broadcast %0 : vector<16x1xi32> to vector<16x12xi32>
    %3 = arith.cmpi eq, %2, %1 : vector<16x12xi32>
    %4 = arith.extui %3 : vector<16x12xi1> to vector<16x12xi32>
    %5 = arith.sitofp %4 : vector<16x12xi32> to vector<16x12xf32>
    %6 = arith.truncf %5 : vector<16x12xf32> to vector<16x12xbf16>
    %c0_1 = arith.constant 0 : index
    %c0_2 = arith.constant 0 : index
    %7 = vector.load %arg2[%c0_1, %c0_2] : memref<12x128xbf16, #tpu.memory_space<vmem>>, vector<12x128xbf16>
    %cst = arith.constant dense<0.000000e+00> : vector<16x128xf32>
    %8 = tpu.matmul %6, %7, %cst {dimension_numbers = #tpu.dot_dimension_numbers<[1], [0], [0], [1], [0, 0, 1, 1], [], []>} : vector<16x12xbf16>, vector<12x128xbf16>, vector<16x128xf32> -> vector<16x128xf32>
    %c0_3 = arith.constant 0 : index
    %c0_4 = arith.constant 0 : index
    %9 = vector.load %arg3[%c0_3, %c0_4] : memref<16x128xf32, #tpu.memory_space<vmem>>, vector<16x128xf32>
    tpu.vector_store %arg3[%c0_3, %c0_4], %8 {strides = array<i32>} : memref<16x128xf32, #tpu.memory_space<vmem>>, vector<16x128xf32>,
    return
  }
  func.func @transform_0(%arg0: i32) -> (i32, i32) {
    %c0_i32 = arith.constant 0 : i32
    %c0_i32_0 = arith.constant 0 : i32
    return %arg0, %c0_i32 : i32, i32
  }
  func.func @transform_1(%arg0: i32) -> (i32, i32) {
    %c0_i32 = arith.constant 0 : i32
    %c0_i32_0 = arith.constant 0 : i32
    %c0_i32_1 = arith.constant 0 : i32
    return %c0_i32, %c0_i32_0 : i32, i32
  }
  func.func @transform_2(%arg0: i32) -> (i32, i32) {
    %c0_i32 = arith.constant 0 : i32
    %c0_i32_0 = arith.constant 0 : i32
    return %arg0, %c0_i32 : i32, i32
  }
}

</mosaic_0001>

<bundles_post_ra>
// kernel: tpu_custom_call.1
= control target key start
LH: loop header
LB: loop body
LE: loop exit
PB: predicated region body
PF: predicated region fallthrough
CT: control target
= control target key end

     0   :  { %v148_v1 = vmov 0   ;;  %v149_v2 = vmov 0.0   ;;  %s190_s0 = inlined_call_operand.vmem [shape: s32[16,1], index: 0, kind: input, shape index: {}]   ;;  %s191_s1 = inlined_call_operand.vmem [shape: bf16[12,128], index: 1, kind: input, shape index: {}]   ;;  %s192_s2 = inlined_call_operand.hbm [shape: f32[16,128], index: 2, kind: output, shape index: {}]  }
   0x1   :  { %v13_v0 = vld [vmem:[%s190_s0] sm:$0xff]  ;;  %122 = vset.pattern.permute.xlu0 %v148_v1  ;;  %110 = vmatprep.subr.bf16.mxu0 %v149_v2 }
   0x2   :  { %7 = vsyncpa [#allocation3], 0  ;;  %18 = vperm.xlu0 %122, %v13_v0   ;;  %v14_v3 = vld [vmem:[%s190_s0 + $0x8] sm:$0xff]  ;;  %v123_v4 = vld [vmem:[%s191_s1] sm:$0x3f]   ;;  %vm41_vm0 = vcmask 1045504   ;;  %v15_v6 = vlaneseq }
   0x3   :  { %v43_v5 = vsel %vm41_vm0, %v123_v4, 0  ;;  %vm150_vm1 = vmmov 0   ;;  %vm37_vm4 = vcmask 97280   ;;  %s151_s0 = smov [#allocation2]  }
   0x4   :  { %111 = vmatpush3.bf16.msra.mxu0 %v43_v5  ;;  %112 = vmatprep.mubr.msk.bf16.mxu0 %vm150_vm1, %v149_v2  ;;  %v16_v7 = vand.u32 127, %v15_v6  ;;  %s93_s15 = sshll.u32 %s151_s0, 4  ;;  %s94_s15 = int_to_ptr.vmem [resolvable:$true] %s93_s15 }
   0x5   :  { %s124_s1 = scalar_lea.vmem %s94_s15, 256  ;;  %p129_p1 = scmp.lt.s32.totalorder %s94_s15, %s94_s15 }
   0x6   :  { %21 = vperm.xlu0 %122, %v14_v3   ;;  %p125_p0 = scmp.ne.s32.totalorder %s94_s15, %s124_s1  ;;  %p130_p2 = scmp.lt.s32.totalorder %s124_s1, %s124_s1 }
   0x8   :  { %p131_p3 = por %p130_p2, %p129_p1 }
   0xa   :  { %p132_p4 = pnand %p131_p3, %p125_p0 }
  0x81   :  { %v19_v8 = vpop.permute.xlu0 %18 }
  0x82   :  { %vm23_vm2 = vcmp.eq.s32.totalorder %v19_v8, %v16_v7 }
  0x83   :  { %v104_v10 = vsel %vm23_vm2, 1.0, %v149_v2 }
  0x85   :  { %v22_v9 = vpop.permute.xlu0 %21 }
  0x86   :  { %vm24_vm3 = vcmp.eq.s32.totalorder %v22_v9, %v16_v7 }
  0x87   :  { %v105_v11 = vsel %vm24_vm3, 1.0, %v149_v2 }
  0x88   :  { %v29_v12 = vpack.c.bf16 %v105_v11, %v104_v10 }
  0x8a   :  { %113 = vmatmul.mubr.msk.bf16.vlgmr.msra.gmra.mrb[0].mxu0 %vm37_vm4, %v29_v12 }
 0x15d   :  { %v79_v13 = vpop.f32.mrb[0].mxu0 }
 0x15e   :  { %86 = vst [vmem:[#allocation2] sm:$0xff] %v79_v13  ;;  %v114_v14 = vpop.f32.mrb[1].mxu0 }
 0x15f   :  { %v82_v15 = vpop.f32.mrb[2].mxu0 }
 0x160   :  { %87 = vst [vmem:[#allocation2 + $0x8] sm:$0xff] %v82_v15  ;;  %v115_v16 = vpop.f32.mrb[3].mxu0 }
 0x161   :  { %135 = shalt.err (!%p132_p4)
}
 0x162   :  { %s136_s18 = scalar_lea.hbm %s192_s2, 256 }
 0x163   :  { %p137_p5 = scmp.ne.s32.totalorder %s192_s2, %s136_s18  ;;  %p140_p6 = scmp.lt.u32.totalorder %s136_s18, %s192_s2 }
 0x165   :  { %p142_p7 = pnand %p140_p6, %p137_p5 }
 0x167   :  { %145 = shalt.err (!%p142_p7)
}
 0x168   :  { %s152_s23 = smov 128   ;;  %s153_s24 = smov 8  }
 0x169   :  { %99 = dma.vmem_to_hbm [thread:$0]  %s94_s15, 256, %s192_s2, [#allocation3], %s152_s23, %s152_s23, %s153_s24  }
 0x16a   :  { %146 = dma.done.wait [#allocation3], 256  }
 0x16b   :  { %147 = vsyncadd [#allocation3], 4294967040 }
 0x16c   :  { %103 = vsyncpa [#allocation3], 1 }

</bundles_post_ra>
